<compile_context>
chip_gen: v7x
topology: tpu7x:2x2x1
jax: 0.10.0
libtpu: 0.0.40
codegen_flags: <defaults>
</compile_context>

<pallas_src>
import jax
import jax.numpy as jnp
from jax.experimental import pallas as pl
from jax.experimental.pallas import tpu as pltpu


def _gru_unit_kernel(adj_ref, x_ref, wa_ref, wx_ref, wh1_ref, b_ref, out_ref):
    # Per grid step: one graph. adj_ref: (1, N, N), x_ref: (1, N, D).
    D = x_ref.shape[-1]

    adj = adj_ref[0].astype(jnp.float32)            # (N, N)
    x = x_ref[0].astype(jnp.float32)                # (N, D)

    # a = adj @ x  (single MXU push per step)
    a = jnp.dot(adj, x, preferred_element_type=jnp.float32)          # (N, D)

    # Fused gate pre-activations.
    ga = jnp.dot(a, wa_ref[...], preferred_element_type=jnp.float32)  # (N, 3D)
    gx = jnp.dot(x, wx_ref[...], preferred_element_type=jnp.float32)  # (N, 2D)
    b = b_ref[...]                                                     # (1, 3D)

    z = jax.nn.sigmoid(ga[:, 0:D] + gx[:, 0:D] + b[:, 0:D])
    r = jax.nn.sigmoid(ga[:, D:2 * D] + gx[:, D:2 * D] + b[:, D:2 * D])

    h_pre = (ga[:, 2 * D:3 * D]
             + jnp.dot(r * x, wh1_ref[...], preferred_element_type=jnp.float32)
             + b[:, 2 * D:3 * D])
    h = jnp.tanh(h_pre)

    # out = h*z + x*(1-z)  ==  x + z*(h - x)
    out = x + z * (h - x)

    out_ref[0] = out.astype(out_ref.dtype)


def fuse_gru_params(wz0, wz1, wr0, wr1, wh0, wh1,
                    bz0, bz1, br0, br1, bh0, bh1):
    """One-time (init-time) fusion of the six per-gate weights / biases."""
    w_a = jnp.concatenate([wz0, wr0, wh0], axis=1)                       # (D, 3D)
    w_x = jnp.concatenate([wz1, wr1], axis=1)                            # (D, 2D)
    b_all = jnp.concatenate([bz0 + bz1, br0 + br1, bh0 + bh1], axis=1)   # (1, 3D)
    return w_a, w_x, wh1, b_all


@jax.jit
def gru_unit_forward(adj, x, w_a, w_x, w_h1, b_all):
    B, N, _ = adj.shape
    D = x.shape[-1]

    # Advisory cost estimate so XLA can overlap this tiny custom call.
    flops = 2 * (B * N * N * D          # a = adj @ x
                 + B * N * D * 6 * D)   # three fused gate GEMMs (3D + 2D + D cols)
    transcendentals = 3 * B * N * D     # 2 sigmoids + 1 tanh per output element
    bytes_accessed = 4 * (adj.size + x.size + w_a.size + w_x.size
                          + w_h1.size + b_all.size + B * N * D)
    cost = pl.CostEstimate(flops=flops,
                           transcendentals=transcendentals,
                           bytes_accessed=bytes_accessed)

    grid_spec = pltpu.PrefetchScalarGridSpec(
        num_scalar_prefetch=0,
        grid=(B,),  # one graph per step; parallel -> usable by both v7x TCs
        in_specs=[
            pl.BlockSpec((1, N, N), lambda b: (b, 0, 0)),
            pl.BlockSpec((1, N, D), lambda b: (b, 0, 0)),
            pl.BlockSpec((D, 3 * D), lambda b: (0, 0)),   # weights stay resident
            pl.BlockSpec((D, 2 * D), lambda b: (0, 0)),
            pl.BlockSpec((D, D), lambda b: (0, 0)),
            pl.BlockSpec((1, 3 * D), lambda b: (0, 0)),
        ],
        out_specs=pl.BlockSpec((1, N, D), lambda b: (b, 0, 0)),
    )

    return pl.pallas_call(
        _gru_unit_kernel,
        out_shape=jax.ShapeDtypeStruct((B, N, D), x.dtype),
        grid_spec=grid_spec,
        compiler_params=pltpu.CompilerParams(
            dimension_semantics=("parallel",)),
        cost_estimate=cost,
    )(adj, x, w_a, w_x, w_h1, b_all)


def glorot(key, shape, dtype=jnp.float32):
    fan_in, fan_out = shape[0], shape[1]
    limit = jnp.sqrt(6.0 / (fan_in + fan_out))
    return jax.random.uniform(key, shape, dtype, minval=-limit, maxval=limit)


def reference_forward(adj, x, wz0, wz1, wr0, wr1, wh0, wh1,
                      bz0, bz1, br0, br1, bh0, bh1):
    a = jnp.matmul(adj, x)
    z = jax.nn.sigmoid(jnp.matmul(a, wz0) + bz0 + jnp.matmul(x, wz1) + bz1)
    r = jax.nn.sigmoid(jnp.matmul(a, wr0) + br0 + jnp.matmul(x, wr1) + br1)
    h = jnp.tanh(jnp.matmul(a, wh0) + bh0 + jnp.matmul(r * x, wh1) + bh1)
    return h * z + x * (1.0 - z)


if __name__ == "__main__":
    B, N, D = 2, 16, 32  # batch (graphs), num graph nodes, output_dim

    key = jax.random.PRNGKey(0)
    keys = jax.random.split(key, 10)

    adj = jax.random.uniform(keys[0], (B, N, N), jnp.float32)
    x = jax.random.normal(keys[1], (B, N, D), jnp.float32)

    wz0 = glorot(keys[2], (D, D))
    wz1 = glorot(keys[3], (D, D))
    wr0 = glorot(keys[4], (D, D))
    wr1 = glorot(keys[5], (D, D))
    wh0 = glorot(keys[6], (D, D))
    wh1 = glorot(keys[7], (D, D))

    bz0 = jnp.zeros((1, D), jnp.float32)
    bz1 = jnp.zeros((1, D), jnp.float32)
    br0 = jnp.zeros((1, D), jnp.float32)
    br1 = jnp.zeros((1, D), jnp.float32)
    bh0 = jnp.zeros((1, D), jnp.float32)
    bh1 = jnp.zeros((1, D), jnp.float32)

    # Weight/bias fusion happens ONCE here (parameter-init time), not per call.
    w_a, w_x, w_h1, b_all = fuse_gru_params(
        wz0, wz1, wr0, wr1, wh0, wh1, bz0, bz1, br0, br1, bh0, bh1)
    w_a, w_x, w_h1, b_all = jax.block_until_ready((w_a, w_x, w_h1, b_all))

    out = gru_unit_forward(adj, x, w_a, w_x, w_h1, b_all)
    out = jax.block_until_ready(out)

    ref = reference_forward(adj, x, wz0, wz1, wr0, wr1, wh0, wh1,
                            bz0, bz1, br0, br1, bh0, bh1)
    assert out.shape == (B, N, D)
    assert jnp.allclose(out, ref, atol=1e-5, rtol=1e-5)

    print("KERNEL_OK")
</pallas_src>

<mosaic_0001>
module attributes {stable_mosaic.version = 11 : i64} {
  func.func @_gru_unit_kernel(%arg0: i32, %arg1: memref<1x16x16xf32, #tpu.memory_space<vmem>>, %arg2: memref<1x16x32xf32, #tpu.memory_space<vmem>>, %arg3: memref<32x96xf32, #tpu.memory_space<vmem>>, %arg4: memref<32x64xf32, #tpu.memory_space<vmem>>, %arg5: memref<32x32xf32, #tpu.memory_space<vmem>>, %arg6: memref<1x96xf32, #tpu.memory_space<vmem>>, %arg7: memref<1x16x32xf32, #tpu.memory_space<vmem>>) attributes {dimension_semantics = [#tpu.dimension_semantics<parallel>], iteration_bounds = array<i64: 2>, scalar_prefetch = 0 : i64, scratch_operands = 0 : i64, tpu.core_type = #tpu.core_type<tc>, window_params = [{transform_indices = @transform_0, window_bounds = array<i64: 1, 16, 16>}, {transform_indices = @transform_1, window_bounds = array<i64: 1, 16, 32>}, {pipeline_mode = #tpu.pipeline_mode<synchronous>, transform_indices = @transform_2, window_bounds = array<i64: 32, 96>}, {pipeline_mode = #tpu.pipeline_mode<synchronous>, transform_indices = @transform_3, window_bounds = array<i64: 32, 64>}, {pipeline_mode = #tpu.pipeline_mode<synchronous>, transform_indices = @transform_4, window_bounds = array<i64: 32, 32>}, {pipeline_mode = #tpu.pipeline_mode<synchronous>, transform_indices = @transform_5, window_bounds = array<i64: 1, 96>}, {transform_indices = @transform_6, window_bounds = array<i64: 1, 16, 32>}]} {
    %c0 = arith.constant 0 : index
    %c0_0 = arith.constant 0 : index
    %c0_1 = arith.constant 0 : index
    %0 = vector.load %arg1[%c0, %c0_0, %c0_1] : memref<1x16x16xf32, #tpu.memory_space<vmem>>, vector<1x16x16xf32>
    %1 = vector.shape_cast %0 : vector<1x16x16xf32> to vector<16x16xf32>
    %c0_2 = arith.constant 0 : index
    %c0_3 = arith.constant 0 : index
    %c0_4 = arith.constant 0 : index
    %2 = vector.load %arg2[%c0_2, %c0_3, %c0_4] : memref<1x16x32xf32, #tpu.memory_space<vmem>>, vector<1x16x32xf32>
    %3 = vector.shape_cast %2 : vector<1x16x32xf32> to vector<16x32xf32>
    %cst = arith.constant dense<0.000000e+00> : vector<16x32xf32>
    %4 = tpu.matmul %1, %3, %cst {dimension_numbers = #tpu.dot_dimension_numbers<[1], [0], [0], [1], [0, 0, 1, 1], [], []>} : vector<16x16xf32>, vector<16x32xf32>, vector<16x32xf32> -> vector<16x32xf32>
    %c0_5 = arith.constant 0 : index
    %c0_6 = arith.constant 0 : index
    %5 = vector.load %arg3[%c0_5, %c0_6] : memref<32x96xf32, #tpu.memory_space<vmem>>, vector<32x96xf32>
    %cst_7 = arith.constant dense<0.000000e+00> : vector<16x96xf32>
    %6 = tpu.matmul %4, %5, %cst_7 {dimension_numbers = #tpu.dot_dimension_numbers<[1], [0], [0], [1], [0, 0, 1, 1], [], []>} : vector<16x32xf32>, vector<32x96xf32>, vector<16x96xf32> -> vector<16x96xf32>
    %c0_8 = arith.constant 0 : index
    %c0_9 = arith.constant 0 : index
    %7 = vector.load %arg4[%c0_8, %c0_9] : memref<32x64xf32, #tpu.memory_space<vmem>>, vector<32x64xf32>
    %cst_10 = arith.constant dense<0.000000e+00> : vector<16x64xf32>
    %8 = tpu.matmul %3, %7, %cst_10 {dimension_numbers = #tpu.dot_dimension_numbers<[1], [0], [0], [1], [0, 0, 1, 1], [], []>} : vector<16x32xf32>, vector<32x64xf32>, vector<16x64xf32> -> vector<16x64xf32>
    %c0_11 = arith.constant 0 : index
    %c0_12 = arith.constant 0 : index
    %9 = vector.load %arg6[%c0_11, %c0_12] : memref<1x96xf32, #tpu.memory_space<vmem>>, vector<1x96xf32>
    %10 = vector.extract_strided_slice %6 {offsets = [0, 0], sizes = [16, 32], strides = [1, 1]} : vector<16x96xf32> to vector<16x32xf32>
    %11 = vector.extract_strided_slice %8 {offsets = [0, 0], sizes = [16, 32], strides = [1, 1]} : vector<16x64xf32> to vector<16x32xf32>
    %12 = arith.addf %10, %11 : vector<16x32xf32>
    %13 = vector.extract_strided_slice %9 {offsets = [0, 0], sizes = [1, 32], strides = [1, 1]} : vector<1x96xf32> to vector<1x32xf32>
    %14 = vector.broadcast %13 : vector<1x32xf32> to vector<16x32xf32>
    %15 = arith.addf %12, %14 : vector<16x32xf32>
    %16 = arith.negf %15 : vector<16x32xf32>
    %17 = math.exp %16 : vector<16x32xf32>
    %cst_13 = arith.constant 1.000000e+00 : f32
    %18 = vector.broadcast %cst_13 : f32 to vector<16x32xf32>
    %19 = arith.addf %18, %17 : vector<16x32xf32>
    %20 = arith.divf %18, %19 : vector<16x32xf32>
    %21 = vector.extract_strided_slice %6 {offsets = [0, 32], sizes = [16, 32], strides = [1, 1]} : vector<16x96xf32> to vector<16x32xf32>
    %22 = vector.extract_strided_slice %8 {offsets = [0, 32], sizes = [16, 32], strides = [1, 1]} : vector<16x64xf32> to vector<16x32xf32>
    %23 = arith.addf %21, %22 : vector<16x32xf32>
    %24 = vector.extract_strided_slice %9 {offsets = [0, 32], sizes = [1, 32], strides = [1, 1]} : vector<1x96xf32> to vector<1x32xf32>
    %25 = vector.broadcast %24 : vector<1x32xf32> to vector<16x32xf32>
    %26 = arith.addf %23, %25 : vector<16x32xf32>
    %27 = arith.negf %26 : vector<16x32xf32>
    %28 = math.exp %27 : vector<16x32xf32>
    %cst_14 = arith.constant 1.000000e+00 : f32
    %29 = vector.broadcast %cst_14 : f32 to vector<16x32xf32>
    %30 = arith.addf %29, %28 : vector<16x32xf32>
    %31 = arith.divf %29, %30 : vector<16x32xf32>
    %32 = vector.extract_strided_slice %6 {offsets = [0, 64], sizes = [16, 32], strides = [1, 1]} : vector<16x96xf32> to vector<16x32xf32>
    %33 = arith.mulf %31, %3 : vector<16x32xf32>
    %c0_15 = arith.constant 0 : index
    %c0_16 = arith.constant 0 : index
    %34 = vector.load %arg5[%c0_15, %c0_16] : memref<32x32xf32, #tpu.memory_space<vmem>>, vector<32x32xf32>
    %cst_17 = arith.constant dense<0.000000e+00> : vector<16x32xf32>
    %35 = tpu.matmul %33, %34, %cst_17 {dimension_numbers = #tpu.dot_dimension_numbers<[1], [0], [0], [1], [0, 0, 1, 1], [], []>} : vector<16x32xf32>, vector<32x32xf32>, vector<16x32xf32> -> vector<16x32xf32>
    %36 = arith.addf %32, %35 : vector<16x32xf32>
    %37 = vector.extract_strided_slice %9 {offsets = [0, 64], sizes = [1, 32], strides = [1, 1]} : vector<1x96xf32> to vector<1x32xf32>
    %38 = vector.broadcast %37 : vector<1x32xf32> to vector<16x32xf32>
    %39 = arith.addf %36, %38 : vector<16x32xf32>
    %40 = math.tanh %39 : vector<16x32xf32>
    %41 = arith.subf %40, %3 : vector<16x32xf32>
    %42 = arith.mulf %20, %41 : vector<16x32xf32>
    %43 = arith.addf %3, %42 : vector<16x32xf32>
    %c0_18 = arith.constant 0 : index
    %c0_19 = arith.constant 0 : index
    %c0_20 = arith.constant 0 : index
    %44 = vector.load %arg7[%c0_18, %c0_19, %c0_20] : memref<1x16x32xf32, #tpu.memory_space<vmem>>, vector<1x16x32xf32>
    %45 = vector.shape_cast %44 : vector<1x16x32xf32> to vector<16x32xf32>
    %46 = vector.shape_cast %43 : vector<16x32xf32> to vector<1x16x32xf32>
    tpu.vector_store %arg7[%c0_18, %c0_19, %c0_20], %46 {strides = array<i32>} : memref<1x16x32xf32, #tpu.memory_space<vmem>>, vector<1x16x32xf32>,
    return
  }
  func.func @transform_0(%arg0: i32) -> (i32, i32, i32) {
    %c0_i32 = arith.constant 0 : i32
    %c0_i32_0 = arith.constant 0 : i32
    %c0_i32_1 = arith.constant 0 : i32
    return %arg0, %c0_i32, %c0_i32_0 : i32, i32, i32
  }
  func.func @transform_1(%arg0: i32) -> (i32, i32, i32) {
    %c0_i32 = arith.constant 0 : i32
    %c0_i32_0 = arith.constant 0 : i32
    %c0_i32_1 = arith.constant 0 : i32
    return %arg0, %c0_i32, %c0_i32_0 : i32, i32, i32
  }
  func.func @transform_2(%arg0: i32) -> (i32, i32) {
    %c0_i32 = arith.constant 0 : i32
    %c0_i32_0 = arith.constant 0 : i32
    %c0_i32_1 = arith.constant 0 : i32
    return %c0_i32, %c0_i32_0 : i32, i32
  }
  func.func @transform_3(%arg0: i32) -> (i32, i32) {
    %c0_i32 = arith.constant 0 : i32
    %c0_i32_0 = arith.constant 0 : i32
    %c0_i32_1 = arith.constant 0 : i32
    return %c0_i32, %c0_i32_0 : i32, i32
  }
  func.func @transform_4(%arg0: i32) -> (i32, i32) {
    %c0_i32 = arith.constant 0 : i32
    %c0_i32_0 = arith.constant 0 : i32
    %c0_i32_1 = arith.constant 0 : i32
    return %c0_i32, %c0_i32_0 : i32, i32
  }
  func.func @transform_5(%arg0: i32) -> (i32, i32) {
    %c0_i32 = arith.constant 0 : i32
    %c0_i32_0 = arith.constant 0 : i32
    %c0_i32_1 = arith.constant 0 : i32
    return %c0_i32, %c0_i32_0 : i32, i32
  }
  func.func @transform_6(%arg0: i32) -> (i32, i32, i32) {
    %c0_i32 = arith.constant 0 : i32
    %c0_i32_0 = arith.constant 0 : i32
    %c0_i32_1 = arith.constant 0 : i32
    return %arg0, %c0_i32, %c0_i32_0 : i32, i32, i32
  }
}

</mosaic_0001>

<bundles_post_ra>
// kernel: gru_unit_forward.1
= control target key start
LH: loop header
LB: loop body
LE: loop exit
PB: predicated region body
PF: predicated region fallthrough
CT: control target
= control target key end

     0   :  { %s1754_s0 = inlined_call_operand.hbm [shape: f32[2,16,16], index: 0, kind: input, shape index: {}]   ;;  %s1755_s1 = inlined_call_operand.hbm [shape: f32[2,16,32], index: 1, kind: input, shape index: {}]   ;;  %s1756_s2 = inlined_call_operand.hbm [shape: f32[32,96], index: 2, kind: input, shape index: {}]   ;;  %s1757_s3 = inlined_call_operand.hbm [shape: f32[32,64], index: 3, kind: input, shape index: {}]   ;;  %s1758_s4 = inlined_call_operand.hbm [shape: f32[32,32], index: 4, kind: input, shape index: {}]   ;;  %s1759_s5 = inlined_call_operand.vmem [shape: f32[1,96], index: 5, kind: input, shape index: {}]   ;;  %s1760_s6 = inlined_call_operand.hbm [shape: f32[2,16,32], index: 6, kind: output, shape index: {}]  }
   0x1   :  { %1768 = sst [smem:[#allocation18_spill]] %s1754_s0 }
   0x2   :  { %1769 = sst [smem:[#allocation19_spill]] %s1756_s2 }
   0x3   :  { %1770 = sst [smem:[#allocation20_spill]] %s1757_s3 }
   0x4   :  { %1771 = sst [smem:[#allocation21_spill]] %s1758_s4 }
   0x5   :  { %11 = vsyncpa [#allocation3], 0 }
   0x6   :  { %13 = vsyncpa [#allocation3 + $0x1], 0 }
   0x7   :  { %14 = vsyncpa [#allocation6], 0 }
   0x8   :  { %16 = vsyncpa [#allocation6 + $0x1], 0 }
   0x9   :  { %17 = vsyncpa [#allocation9], 0 }
   0xa   :  { %18 = vsyncpa [#allocation4], 0 }
   0xb   :  { %20 = vsyncpa [#allocation4 + $0x1], 0  ;;  %s1405_s21 = smov 0   ;;  %s1407_s22 = smov 0  }
   0xc   :  { %s1409_s23 = smov 0   ;;  %s1411_s24 = smov 0  }
   0xd LB: > { %s1426_s25 = sadd.s32 4294967295, %s1355_s24   ;;  %s904_s26 = sadd.s32 4294967294, %s1355_s24   ;;  %s1355_s24 = sphi %s1411_s24, %s1799_s24   ;;  %s1351_s23 = sphi %s1409_s23, %s1798_s23   ;;  %s1347_s22 = sphi %s1407_s22, %s1797_s22   ;;  %s1343_s21 = sphi %s1405_s21, %s1796_s21  }
   0xe   : > { %p46_p0 = scmp.ne.s32.totalorder %s1347_s22, %s1343_s21  ;;  %p1761_p1 = scmp.eq.s32.totalorder %s1426_s25, 0 }
   0xf   : > { %p186_p3 = scmp.eq.s32.totalorder %s904_s26, 1  ;;  %p905_p5 = scmp.ge.s32.totalorder %s1355_s24, 1 }
  0x10   : > { %p1435_p4 = por %p1761_p1, %p46_p0  ;;  %p193_p7 = scmp.lt.s32.totalorder %s1355_s24, 3 }
  0x11   : > { %p1440_p6 = por %p186_p3, %p46_p0  ;;  %s1357_s30 = smov [#allocation7]  }
  0x12   : > { %s1772_s27 = scalar_select %p1435_p4, 1, 0 }
  0x13   : > { %s1773_s28 = scalar_select %p1440_p6, 1, 0 }
  0x14   : > { %p1445_p8 = pnand %p905_p5, %p193_p7  ;;  %s205_s7 = sshll.u32 %s1357_s30, 4  ;;  %s1449_s7 = int_to_ptr.vmem [resolvable:$true] %s205_s7 }
  0x15   : > { %s1358_s9 = smov [#allocation8]   ;;  %s1359_s11 = smov [#allocation10]  }
  0x16   : > { %s1774_s29 = scalar_select %p1445_p8, 1, 0 }
  0x17   : > { %p1050_p9 = pneg %p1445_p8  ;;  %s218_s10 = sshll.u32 %s1358_s9, 4  ;;  %s1460_s10 = int_to_ptr.vmem [resolvable:$true] %s218_s10 }
  0x18   : > { %s1462_s12 = sshll.u32 %s1359_s11, 4  ;;  %s1776_s2 = sld [smem:[#allocation19_spill]]  ;;  %s232_s12 = int_to_ptr.vmem [resolvable:$true] %s1462_s12 }
  0x19   : > { %p1456_p11 = pnand %p1050_p9, %p1761_p1 }
  0x1b   : > { %p1472_p13 = pneg %p1456_p11 }
  0x1e   : > { %s1133_s15 = scalar_lea.hbm %s1776_s2, 512 }
  0x1f   : > { %p1134_p12 = scmp.ne.s32.totalorder %s1776_s2, %s1133_s15  ;;  %p1140_p5 = scmp.lt.u32.totalorder %s1133_s15, %s1776_s2 }
  0x21   : > { %p1136_p0 = pnand %p1472_p13, %p1134_p12 }
  0x23   : > { %p1137_p3 = pneg %p1136_p0 }
  0x25   : > { %p1142_p7 = pnand %p1140_p5, %p1137_p3 }
  0x27   : > { %1145 = shalt.err (!%p1142_p7)
}
  0x28   : > { %s1146_s26 = scalar_lea.vmem %s1449_s7, 512  ;;  %p1154_p2 = scmp.lt.s32.totalorder %s1449_s7, %s1449_s7 }
  0x29   : > { %p1147_p9 = scmp.ne.s32.totalorder %s1449_s7, %s1146_s26  ;;  %p1155_p6 = scmp.lt.s32.totalorder %s1146_s26, %s1146_s26 }
  0x2b   : > { %p1149_p10 = pnand %p1147_p9, %p1472_p13  ;;  %p1156_p12 = por %p1155_p6, %p1154_p2 }
  0x2d   : > { %p1150_p1 = pneg %p1149_p10 }
  0x2f   : > { %p1157_p0 = pnand %p1156_p12, %p1150_p1 }
  0x31   : > { %1160 = shalt.err (!%p1157_p0)
}
  0x32   : > { %s1764_s30 = smov 128   ;;  %s1766_s9 = smov 8  }
  0x33   : > { %1053 = dma.hbm_to_vmem [thread:$0]  (!%p1456_p11), %s1776_s2, 512, %s1449_s7, [#allocation6], %s1764_s30, %s1764_s30, %s1766_s9  }
  0x34   : > { %s1778_s3 = sld [smem:[#allocation20_spill]] }
  0x3a   : > { %s1161_s16 = scalar_lea.hbm %s1778_s3, 512 }
  0x3b   : > { %p1162_p1 = scmp.ne.s32.totalorder %s1778_s3, %s1161_s16  ;;  %p1168_p10 = scmp.lt.u32.totalorder %s1161_s16, %s1778_s3 }
  0x3d   : > { %p1164_p2 = pnand %p1162_p1, %p1472_p13 }
  0x3f   : > { %p1165_p6 = pneg %p1164_p2 }
  0x41   : > { %p1170_p3 = pnand %p1168_p10, %p1165_p6 }
  0x43   : > { %1173 = shalt.err (!%p1170_p3)
}
  0x44   : > { %s1174_s7 = scalar_lea.vmem %s1460_s10, 512  ;;  %p1182_p12 = scmp.lt.s32.totalorder %s1460_s10, %s1460_s10 }
  0x45   : > { %p1175_p5 = scmp.ne.s32.totalorder %s1460_s10, %s1174_s7  ;;  %p1183_p0 = scmp.lt.s32.totalorder %s1174_s7, %s1174_s7 }
  0x47   : > { %p1177_p7 = pnand %p1175_p5, %p1472_p13  ;;  %p1184_p1 = por %p1183_p0, %p1182_p12 }
  0x49   : > { %p1178_p9 = pneg %p1177_p7 }
  0x4b   : > { %p1185_p2 = pnand %p1184_p1, %p1178_p9 }
  0x4d   : > { %1188 = shalt.err (!%p1185_p2)
}
  0x4e   : > { %1056 = dma.hbm_to_vmem [thread:$0]  (!%p1456_p11), %s1778_s3, 512, %s1460_s10, [#allocation9], %s1764_s30, %s1764_s30, %s1766_s9  }
  0x4f   : > { %s1779_s4 = sld [smem:[#allocation21_spill]] }
  0x55   : > { %s1189_s16 = scalar_lea.hbm %s1779_s4, 512 }
  0x56   : > { %p1190_p6 = scmp.ne.s32.totalorder %s1779_s4, %s1189_s16  ;;  %p1196_p5 = scmp.lt.u32.totalorder %s1189_s16, %s1779_s4 }
  0x58   : > { %p1192_p10 = pnand %p1190_p6, %p1472_p13 }
  0x5a   : > { %p1193_p3 = pneg %p1192_p10 }
  0x5c   : > { %p1198_p7 = pnand %p1196_p5, %p1193_p3 }
  0x5e   : > { %1201 = shalt.err (!%p1198_p7)
}
  0x5f   : > { %s1202_s7 = scalar_lea.vmem %s232_s12, 512  ;;  %p1210_p1 = scmp.lt.s32.totalorder %s232_s12, %s232_s12 }
  0x60   : > { %p1203_p9 = scmp.ne.s32.totalorder %s232_s12, %s1202_s7  ;;  %p1211_p2 = scmp.lt.s32.totalorder %s1202_s7, %s1202_s7 }
  0x62   : > { %p1205_p12 = pnand %p1203_p9, %p1472_p13  ;;  %p1212_p4 = por %p1211_p2, %p1210_p1 }
  0x64   : > { %p1206_p0 = pneg %p1205_p12 }
  0x66   : > { %p1213_p8 = pnand %p1212_p4, %p1206_p0 }
  0x68   : > { %1216 = shalt.err (!%p1213_p8)
}
  0x69   : > { %1059 = dma.hbm_to_vmem [thread:$0]  (!%p1456_p11), %s1779_s4, 512, %s232_s12, [#allocation9], %s1764_s30, %s1764_s30, %s1766_s9  }
  0x6a   : > { %s1545_s18 = sadd.s32 1, %s1355_s24   ;;  %s33_s13 = sadd.s32 1, %s1351_s23 }
  0x6b   : > { %s30_s8 = ssub.s32 %s1355_s24, %s1545_s18  ;;  %p40_p8 = scmp.ne.s32.totalorder %s1351_s23, %s1347_s22 }
  0x6c   : > { %p31_p4 = scmp.eq.s32.totalorder %s30_s8, 0  ;;  %p41_p13 = scmp.eq.s32.totalorder %s1355_s24, 0 }
  0x6d   : > { %p1074_p6 = scmp.lt.s32.totalorder %s1355_s24, 2  ;;  %p1781_p3 = scmp.eq.s32.totalorder %s1426_s25, 1 }
  0x6e   : > { %s1555_s14 = scalar_select %p31_p4, %s1351_s23, %s33_s13  }
  0x6f   : > { %p42_p10 = por %p41_p13, %p40_p8  ;;  %p1559_p5 = por %p1781_p3, %p40_p8 }
  0x70   : > { %1780 = sst [smem:[#allocation17_spill]] %s1555_s14  ;;  %s248_s16 = sand.u32 1, %s1351_s23  }
  0x71   : > { %s939_s17 = sshll.u32 %s1355_s24, 8  ;;  %s1565_s12 = sshll.u32 %s248_s16, 4 }
  0x72   : > { %s1783_s0 = sld [smem:[#allocation18_spill]]  ;;  %s252_s7 = scalar_lea.vmem [#allocation2], %s1565_s12 }
  0x73   : > { %s259_s10 = sshll.u32 %s252_s7, 4  ;;  %p1573_p11 = pnand %p1074_p6, %p42_p10  ;;  %s1577_s10 = int_to_ptr.vmem [resolvable:$true] %s259_s10 }
  0x74   : > { %s1582_s19 = scalar_lea.hbm %s1755_s1, %s939_s17  ;;  %s1584_s20 = scalar_lea.sflag [#allocation3], %s248_s16 }
  0x75   : > { %p1219_p9 = pneg %p1573_p11 }
  0x78   : > { %s1570_s26 = scalar_lea.hbm %s1783_s0, %s939_s17  ;;  %s1222_s2 = scalar_lea.hbm %s1783_s0, 512 }
  0x79   : > { %s1217_s30 = scalar_lea.hbm %s1570_s26, 256  ;;  %p1223_p1 = scmp.lt.u32.totalorder %s1570_s26, %s1783_s0 }
  0x7a   : > { %p1218_p7 = scmp.ne.s32.totalorder %s1570_s26, %s1217_s30  ;;  %p1224_p2 = scmp.lt.u32.totalorder %s1222_s2, %s1217_s30 }
  0x7b   : > { %p1226_p8 = scmp.lt.u32.totalorder %s1217_s30, %s1570_s26 }
  0x7c   : > { %p1220_p12 = pnand %p1219_p9, %p1218_p7  ;;  %p1225_p4 = por %p1224_p2, %p1223_p1 }
  0x7e   : > { %p1221_p0 = pneg %p1220_p12  ;;  %p1227_p13 = por %p1226_p8, %p1225_p4 }
  0x80   : > { %p1228_p6 = pnand %p1227_p13, %p1221_p0 }
  0x82   : > { %1231 = shalt.err (!%p1228_p6)
}
  0x83   : > { %s1232_s16 = scalar_lea.vmem %s1577_s10, 256  ;;  %s1362_s9 = smov [#allocation2]  }
  0x84   : > { %p1233_p10 = scmp.ne.s32.totalorder %s1577_s10, %s1232_s16  ;;  %s1237_s17 = sshll.u32 %s1362_s9, 4  ;;  %s1238_s17 = int_to_ptr.vmem [resolvable:$false] %s1237_s17 }
  0x85   : > { %s1239_s3 = scalar_lea.vmem %s1238_s17, 512  ;;  %p1240_p12 = scmp.lt.s32.totalorder %s1577_s10, %s1238_s17 }
  0x86   : > { %p1235_p3 = pnand %p1233_p10, %p1219_p9  ;;  %p1241_p1 = scmp.lt.s32.totalorder %s1239_s3, %s1232_s16 }
  0x88   : > { %p1236_p7 = pneg %p1235_p3  ;;  %p1242_p2 = por %p1241_p1, %p1240_p12 }
  0x8a   : > { %p1243_p4 = pnand %p1242_p2, %p1236_p7 }
  0x8c   : > { %1246 = shalt.err (!%p1243_p4)
}
  0x8d   : > { %s1785_s2 = smov 8   ;;  %s1786_s4 = smov 128  }
  0x8e   : > { %1063 = dma.hbm_to_vmem [thread:$0]  (!%p1573_p11), %s1570_s26, 256, %s1577_s10, %s1584_s20, %s1786_s4, %s1786_s4, %s1785_s2  }
  0x8f   : > { %s273_s30 = scalar_lea.vmem [#allocation5], %s1565_s12  ;;  %s269_s13 = sand.u32 1, %s1355_s24  }
  0x90   : > { %s280_s8 = sshll.u32 %s273_s30, 4  ;;  %s1619_s7 = scalar_lea.sflag [#allocation6], %s269_s13  ;;  %s1617_s8 = int_to_ptr.vmem [resolvable:$true] %s280_s8 }
  0x91   : > { %s1247_s16 = scalar_lea.hbm %s1582_s19, 256  ;;  %s1252_s3 = scalar_lea.hbm %s1755_s1, 512 }
  0x92   : > { %p1248_p0 = scmp.ne.s32.totalorder %s1582_s19, %s1247_s16  ;;  %p1253_p6 = scmp.lt.u32.totalorder %s1582_s19, %s1755_s1 }
  0x93   : > { %p1254_p10 = scmp.lt.u32.totalorder %s1252_s3, %s1247_s16  ;;  %p1256_p7 = scmp.lt.u32.totalorder %s1247_s16, %s1582_s19 }
  0x94   : > { %p1250_p8 = pnand %p1248_p0, %p1219_p9 }
  0x95   : > { %p1255_p3 = por %p1254_p10, %p1253_p6 }
  0x96   : > { %p1251_p13 = pneg %p1250_p8 }
  0x97   : > { %p1257_p12 = por %p1256_p7, %p1255_p3 }
  0x99   : > { %p1258_p1 = pnand %p1257_p12, %p1251_p13 }
  0x9b   : > { %1261 = shalt.err (!%p1258_p1)
}
  0x9c   : > { %s1262_s12 = scalar_lea.vmem %s1617_s8, 256  ;;  %s1363_s26 = smov [#allocation5]  }
  0x9d   : > { %p1263_p2 = scmp.ne.s32.totalorder %s1617_s8, %s1262_s12  ;;  %s1267_s10 = sshll.u32 %s1363_s26, 4  ;;  %s1268_s10 = int_to_ptr.vmem [resolvable:$false] %s1267_s10 }
  0x9e   : > { %s1269_s0 = scalar_lea.vmem %s1268_s10, 512  ;;  %p1270_p8 = scmp.lt.s32.totalorder %s1617_s8, %s1268_s10 }
  0x9f   : > { %p1265_p4 = pnand %p1263_p2, %p1219_p9  ;;  %p1271_p6 = scmp.lt.s32.totalorder %s1269_s0, %s1262_s12 }
  0xa1   : > { %p1266_p0 = pneg %p1265_p4  ;;  %p1272_p10 = por %p1271_p6, %p1270_p8 }
  0xa3   : > { %p1273_p3 = pnand %p1272_p10, %p1266_p0 }
  0xa5   : > { %1276 = shalt.err (!%p1273_p3)
}
  0xa6   : > { %1066 = dma.hbm_to_vmem [thread:$0]  (!%p1573_p11), %s1582_s19, 256, %s1617_s8, %s1619_s7, %s1786_s4, %s1786_s4, %s1785_s2  }
  0xa7   : > { %p1787_p9 = scmp.ne.s32.totalorder %s1774_s29, 0 }
  0xa8   : > { %s1651_s14 = sand.u32 (!%p1787_p9), 1, %s1347_s22   ;;  %p1788_p13 = scmp.ne.s32.totalorder (!%p1787_p9), %s1772_s27, 0 }
  0xa9   : > { %292 = sbr.rel (%p1787_p9) target bundleno = 1251 (0x4e3), region = 44  ;;  %s1654_s20 = sshll.u32 (!%p1787_p9), %s1651_s14, 4 }
  0xaa   : > { %s295_s11 = scalar_lea.sflag (!%p1787_p9), [#allocation3], %s1651_s14  ;;  %s298_s30 = scalar_lea.vmem (!%p1787_p9), [#allocation2], %s1654_s20 }
  0xb0   : > { %1322 = dma.done.wait (%p1788_p13), %s295_s11, 256  }
  0xb1   : > { %1324 = vsyncadd (%p1788_p13), %s295_s11, 4294967040  ;;  %s303_s29 = sand.u32 1, %s1426_s25   ;;  %s307_s2 = scalar_lea.vmem [#allocation5], %s1654_s20 }
  0xb2   : > { %s304_s19 = scalar_lea.sflag [#allocation6], %s303_s29 }
  0xb3   : > { %1326 = dma.done.wait (%p1788_p13), %s304_s19, 256  }
  0xb4   : > { %1328 = vsyncadd (%p1788_p13), %s304_s19, 4294967040  ;;  %p1789_p11 = scmp.eq.s32.totalorder %s1426_s25, 0 }
  0xb6   : > { %1330 = dma.done.wait (%p1789_p11), [#allocation6], 512   ;;  %p1790_p7 = pmov %p1789_p11 }
  0xb8   : > { %1332 = vsyncadd (%p1790_p7), [#allocation6], 4294966784  ;;  %p1791_p12 = pmov %p1790_p7 }
  0xb9   : > { %p1792_p1 = pmov %p1790_p7 }
  0xba   : > { %1334 = dma.done.wait (%p1791_p12), [#allocation9], 1024  }
  0xbb   : > { %1336 = vsyncadd (%p1792_p1), [#allocation9], 4294966272  ;;  %vm357_vm0 = vcmask 130048   ;;  %v1676_v0 = vld [vmem:[%s307_s2] sm:$0xff]  ;;  %v1678_v1 = vld [vmem:[%s307_s2 + $0x8] sm:$0xff]  ;;  %vm443_vm1 = vcmask 261120  }
  0xbc   : > { %v353_v2 = vld [vmem:[%s298_s30] sm:$0xff]  ;;  %v1004_v3 = vpack.c.bf16 %v1678_v1, %v1676_v0  ;;  %v526_v5 = vld [vmem:[#allocation8 + $0x8] sm:$0xff]  ;;  %v528_v11 = vld [vmem:[#allocation8 + $0x18] sm:$0xff]  ;;  %s1364_s27 = smov 32   ;;  %s1365_s13 = smov 96  }
  0xbd   : > { %968 = vmatprep.mubr.msk.f32.mxu0 %vm357_vm0, %v353_v2  ;;  %v525_v4 = vld [vmem:[#allocation8] sm:$0xff]  ;;  %v440_v8 = vld [vmem:[#allocation7 + $0x8] sm:$0xff]  ;;  %v527_v9 = vld [vmem:[#allocation8 + $0x10] sm:$0xff]  ;;  %633 = vrot.lane.b32.xlu0 %v1676_v0, %s1364_s27  ;;  %s1366_s7 = smov 64   ;;  %s941_s16 = sshll.u32 %s1426_s25, 8 }
  0xbe   : > { %v1016_v6 = vpack.c.bf16 %v526_v5, %v525_v4  ;;  %v439_v7 = vld [vmem:[#allocation7] sm:$0xff]  ;;  %1005 = vmatprep.subr.bf16.mxu0 %v1004_v3  ;;  %v441_v12 = vld [vmem:[#allocation7 + $0x10] sm:$0xff]  ;;  %v442_v13 = vld [vmem:[#allocation7 + $0x18] sm:$0xff]  ;;  %v1020_v16 = vpack.c.bf16 %v528_v11, %v527_v9  ;;  %s352_s9 = scalar_lea.vmem [#allocation11], %s1654_s20  ;;  %s1705_s26 = scalar_lea.hbm %s1760_s6, %s941_s16 }
  0xbf   : > { %v1008_v10 = vpack.c.bf16 %v440_v8, %v439_v7  ;;  %1007 = vmatpush3.bf16.msra.mxu0 %v1004_v3  ;;  %v354_v14 = vld [vmem:[%s298_s30 + $0x8] sm:$0xff]  ;;  %v1012_v15 = vpack.c.bf16 %v442_v13, %v441_v12  ;;  %v641_v21 = vld [vmem:[#allocation10] sm:$0xff]  ;;  %v643_v35 = vld [vmem:[#allocation10 + $0x10] sm:$0xff]  ;;  %s780_s17 = sshll.u32 %s352_s9, 4  ;;  %s767_s25 = scalar_lea.sflag [#allocation4], %s1651_s14  ;;  %s1707_s17 = int_to_ptr.vmem [resolvable:$true] %s780_s17 }
  0xc0   : > { %1017 = vmatprep.subr.bf16.mxu0 %v1016_v6  ;;  %v642_v22 = vld [vmem:[#allocation10 + $0x8] sm:$0xff]  ;;  %v929_v25 = vld [vmem:[%s1759_s5] ss:$0 sm:$0xff]  ;;  %v644_v36 = vld [vmem:[#allocation10 + $0x18] sm:$0xff]  ;;  %s1277_s10 = scalar_lea.vmem %s1707_s17, 256  ;;  %s1367_s0 = smov [#allocation11]  }
  0xc1   : > { %1009 = vmatprep.subr.bf16.mxu1 %v1008_v10  ;;  %635 = vrot.lane.b32.xlu0 %v1678_v1, %s1364_s27  ;;  %v1024_v23 = vpack.c.bf16 %v642_v22, %v641_v21  ;;  %v1028_v39 = vpack.c.bf16 %v644_v36, %v643_v35  ;;  %p1278_p2 = scmp.ne.s32.totalorder %s1707_s17, %s1277_s10  ;;  %s1281_s20 = sshll.u32 %s1367_s0, 4  ;;  %s1282_s20 = int_to_ptr.vmem [resolvable:$false] %s1281_s20 }
  0xc2   : > { %1011 = vmatpush3.bf16.msra.mxu1 %v1008_v10  ;;  %969 = vmatmul.mubr.msk.f32.vlgmr.msra.gmra.mrb[0].mxu0 %vm357_vm0, %v354_v14  ;;  %s1283_s11 = scalar_lea.vmem %s1282_s20, 512  ;;  %p1284_p8 = scmp.lt.s32.totalorder %s1707_s17, %s1282_s20 }
  0xc3   : > { %1013 = vmatprep.subr.bf16.mxu1 %v1012_v15  ;;  %1019 = vmatpush3.bf16.msra.mxu0 %v1016_v6  ;;  %p1279_p4 = pnand %p1278_p2, %p1559_p5  ;;  %p1285_p6 = scmp.lt.s32.totalorder %s1283_s11, %s1277_s10 }
  0xc4   : > { %1021 = vmatprep.subr.bf16.mxu0 %v1020_v16  ;;  %990 = vmatprep.mubr.msk.f32.mxu0 %vm443_vm1, %v1676_v0 }
  0xc5   : > { %p1280_p0 = pneg %p1279_p4  ;;  %p1286_p10 = por %p1285_p6, %p1284_p8 }
  0xc6   : > { %1015 = vmatpush3.bf16.msra.mxu1 %v1012_v15 }
  0xc7   : > { %1023 = vmatpush3.bf16.msra.mxu0 %v1020_v16  ;;  %1025 = vmatprep.subr.bf16.mxu1 %v1024_v23  ;;  %p1287_p3 = pnand %p1286_p10, %p1280_p0 }
  0xca   : > { %991 = vmatmul.mubr.msk.f32.vlgmr.msra.gmra.mrb[2].mxu0 %vm443_vm1, %v1678_v1 }
 0x12f   : > { %v634_v40 = vpop.permute.xlu0 %633 }
 0x133   : > { %v636_v44 = vpop.permute.xlu0 %635 }
 0x195   : > { %v970_v17 = vpop.f32.mrb[0].mxu0 }
 0x196   : > { %v430_v18 = vpop.f32.mrb[1].mxu0 }
 0x197   : > { %979 = vmatprep.mubr.msk.f32.mxu1 %vm443_vm1, %v430_v18 }
 0x198   : > { %980 = vmatmul.mubr.msk.f32.vlgmr.msra.gmra.mrb[0].mxu1 %vm443_vm1, %v970_v17 }
 0x199   : > { %1027 = vmatpush3.bf16.msra.mxu1 %v1024_v23 }
 0x19a   : > { %1029 = vmatprep.subr.bf16.mxu1 %v1028_v39 }
 0x19d   : > { %v992_v19 = vpop.f32.mrb[2].mxu0  ;;  %1031 = vmatpush3.bf16.msra.mxu1 %v1028_v39 }
 0x19e   : > { %v601_v20 = vpop.f32.mrb[3].mxu0 }
 0x26b   : > { %v981_v24 = vpop.f32.mrb[0].mxu1 }
 0x26c   : > { %v612_v26 = vadd.f32 %v992_v19, %v981_v24  ;;  %v516_v27 = vpop.f32.mrb[1].mxu1 }
 0x26d   : > { %v611_v28 = vadd.f32 %v601_v20, %v516_v27 }
 0x26e   : > { %v620_v29 = vadd.f32 %v929_v25, %v612_v26 }
 0x26f   : > { %v619_v30 = vadd.f32 %v929_v25, %v611_v28 }
 0x270   : > { %v931_v31 = vmul.f32 -1.442695, %v620_v29 }
 0x271   : > { %v930_v32 = vmul.f32 -1.442695, %v619_v30 }
 0x272   : > { %1121 = vpow2.f32 %v931_v31 }
 0x273   : > { %1123 = vpow2.f32 %v930_v32 }
 0x27c   : > { %v1122_v33 = vpop.eup %1121 }
 0x27d   : > { %v1124_v34 = vpop.eup %1123  ;;  %v628_v37 = vadd.f32 1.0, %v1122_v33 }
 0x27e   : > { %v627_v38 = vadd.f32 1.0, %v1124_v34 }
 0x280   : > { %1125 = vrcp.f32 %v627_v38 }
 0x281   : > { %1127 = vrcp.f32 %v628_v37 }
 0x28a   : > { %v1126_v41 = vpop.eup %1125 }
 0x28b   : > { %v639_v42 = vmul.f32 %v1126_v41, %v634_v40  ;;  %v1128_v43 = vpop.eup %1127 }
 0x28c   : > { %v640_v45 = vmul.f32 %v1128_v43, %v636_v44 }
 0x28d   : > { %647 = vrot.lane.b32.xlu1 %v639_v42, %s1365_s13 }
 0x291   : > { %649 = vrot.lane.b32.xlu1 %v640_v45, %s1365_s13 }
 0x2ff   : > { %v648_v46 = vpop.permute.xlu1 %647 }
 0x300   : > { %1001 = vmatprep.mubr.msk.f32.mxu1 %vm443_vm1, %v648_v46 }
 0x303   : > { %v650_v47 = vpop.permute.xlu1 %649 }
 0x304   : > { %1002 = vmatmul.mubr.msk.f32.vlgmr.msra.gmra.mrb[2].mxu1 %vm443_vm1, %v650_v47 }
 0x3d7   : > { %v1003_v48 = vpop.f32.mrb[2].mxu1 }
 0x3d8   : > { %734 = vrot.lane.b32.xlu1 %v1003_v48, %s1366_s7  ;;  %v721_v49 = vpop.f32.mrb[3].mxu1 }
 0x3d9   : > { %732 = vrot.lane.b32.xlu0 %v721_v49, %s1366_s7 }
 0x3dc   : > { %746 = vrot.lane.b32.xlu1 %v1678_v1, %s1366_s7 }
 0x3dd   : > { %744 = vrot.lane.b32.xlu0 %v1676_v0, %s1366_s7 }
 0x44a   : > { %v735_v50 = vpop.permute.xlu1 %734 }
 0x44b   : > { %v739_v51 = vadd.f32 %v981_v24, %v735_v50  ;;  %v733_v52 = vpop.permute.xlu0 %732 }
 0x44c   : > { %v738_v53 = vadd.f32 %v733_v52, %v516_v27 }
 0x44d   : > { %v741_v54 = vadd.f32 %v929_v25, %v739_v51 }
 0x44e   : > { %v740_v55 = vadd.f32 %v929_v25, %v738_v53  ;;  %v747_v56 = vpop.permute.xlu1 %746 }
 0x44f   : > { %1129 = vtanh.f32 %v741_v54  ;;  %v745_v57 = vpop.permute.xlu0 %744 }
 0x450   : > { %1131 = vtanh.f32 %v740_v55 }
 0x459   : > { %v1130_v58 = vpop.eup %1129 }
 0x45a   : > { %v1132_v59 = vpop.eup %1131  ;;  %v751_v60 = vsub.f32 %v1130_v58, %v747_v56 }
 0x45b   : > { %v750_v61 = vsub.f32 %v1132_v59, %v745_v57 }
 0x45c   : > { %756 = vrot.lane.b32.xlu1 %v751_v60, %s1366_s7 }
 0x45d   : > { %754 = vrot.lane.b32.xlu0 %v750_v61, %s1366_s7 }
 0x4ce   : > { %v757_v62 = vpop.permute.xlu1 %756 }
 0x4cf   : > { %v761_v63 = vmul.f32 %v1128_v43, %v757_v62  ;;  %v755_v2 = vpop.permute.xlu0 %754 }
 0x4d0   : > { %v760_v3 = vmul.f32 %v1126_v41, %v755_v2 }
 0x4d1   : > { %v763_v4 = vadd.f32 %v761_v63, %v1678_v1 }
 0x4d2   : > { %v762_v5 = vadd.f32 %v760_v3, %v1676_v0 }
 0x4d3   : > { %765 = vst.msk [vmem:[%s352_s9 + $0x8] sm:$0xff] %vm443_vm1, %v763_v4 }
 0x4d4   : > { %764 = vst.msk [vmem:[%s352_s9] sm:$0xff] %vm443_vm1, %v762_v5 }
 0x4d5   : > { %1290 = shalt.err (!%p1287_p3)
}
 0x4d6   : > { %s1291_s30 = scalar_lea.hbm %s1705_s26, 256  ;;  %s1295_s2 = scalar_lea.hbm %s1760_s6, 512 }
 0x4d7   : > { %p1292_p9 = scmp.ne.s32.totalorder %s1705_s26, %s1291_s30  ;;  %p1296_p7 = scmp.lt.u32.totalorder %s1705_s26, %s1760_s6 }
 0x4d8   : > { %p1297_p12 = scmp.lt.u32.totalorder %s1295_s2, %s1291_s30  ;;  %p1299_p2 = scmp.lt.u32.totalorder %s1291_s30, %s1705_s26 }
 0x4d9   : > { %p1293_p13 = pnand %p1292_p9, %p1559_p5 }
 0x4da   : > { %p1298_p1 = por %p1297_p12, %p1296_p7 }
 0x4db   : > { %p1294_p11 = pneg %p1293_p13 }
 0x4dc   : > { %p1300_p4 = por %p1299_p2, %p1298_p1 }
 0x4de   : > { %p1301_p0 = pnand %p1300_p4, %p1294_p11 }
 0x4e0   : > { %1304 = shalt.err (!%p1301_p0)
}
 0x4e1   : > { %s1368_s8 = smov 128   ;;  %s1369_s13 = smov 8  }
 0x4e2   : > { %1048 = dma.vmem_to_hbm [thread:$0]  (%p1559_p5), %s1707_s17, 256, %s1705_s26, %s767_s25, %s1368_s8, %s1368_s8, %s1369_s13  }
 0x4e3 PF: > { %s795_s7 = sand.u32 1, %s1343_s21   ;;  %p1793_p8 = scmp.ne.s32.totalorder %s1773_s28, 0 }
 0x4e4   : > { %p1794_p6 = scmp.ge.s32.totalorder %s1355_s24, 2  ;;  %s796_s16 = scalar_lea.sflag [#allocation4], %s795_s7 }
 0x4e6   : > { %p1068_p10 = pnand %p1794_p6, %p1793_p8 }
 0x4e8   : > { %1338 = dma.done.wait (!%p1068_p10), %s796_s16, 256  }
 0x4e9   : > { %1340 = vsyncadd (!%p1068_p10), %s796_s16, 4294967040  ;;  %s1795_s9 = sld [smem:[#allocation17_spill]]  ;;  %p23_p3 = scmp.ge.s32.totalorder %s1545_s18, 4  }
 0x4ea   : > { %s1796_s21 = smov %s1347_s22  ;;  %s1797_s22 = smov %s1351_s23 }
 0x4eb   : > { %s1799_s24 = smov %s1545_s18  ;;  %25 = sbr.rel (!%p23_p3) target bundleno = 13 (0xd), region = 114 }
 0x4ef   : > { %s1798_s23 = smov %s1795_s9 }
 0x4f2   :  { %801 = vsyncpa [#allocation3], 1 }
 0x4f3   :  { %803 = vsyncpa [#allocation3 + $0x1], 1 }
 0x4f4   :  { %804 = vsyncpa [#allocation6], 1 }
 0x4f5   :  { %806 = vsyncpa [#allocation6 + $0x1], 1 }
 0x4f6   :  { %807 = vsyncpa [#allocation9], 1 }
 0x4f7   :  { %808 = vsyncpa [#allocation4], 1 }
 0x4f8   :  { %810 = vsyncpa [#allocation4 + $0x1], 1 }

</bundles_post_ra>
